<compile_context>
chip_gen: v5e
topology: v5e:2x2
jax: 0.10.0
libtpu: 0.0.40
codegen_flags: <defaults>
</compile_context>

<pallas_src>
import numpy as np
import jax
import jax.numpy as jnp
from jax.experimental import pallas as pl
from jax.experimental.pallas import tpu as pltpu

_LANE = 128
_SUBLANE = 8
_MAX_BLOCK_BYTES = 4 << 20      # ~4 MiB per block -> ~16 MiB live with double buffering
_VMEM_LIMIT_BYTES = 32 << 20


def _round_up(n, m):
    return ((n + m - 1) // m) * m


def _choose_tiles(B, D, itemsize):
    """Pick (tb, tn) block sizes for the un-padded (B, D) elementwise kernel."""
    # Feature tile: keep the full feature dim in one lane-dense block unless even an
    # 8-row slab exceeds the block budget (then tile features in 128-lane multiples).
    if D * itemsize * _SUBLANE <= _MAX_BLOCK_BYTES:
        tn = D
    else:
        tn = max(_LANE, (_MAX_BLOCK_BYTES // (_SUBLANE * itemsize)) // _LANE * _LANE)

    # Batch tile: largest multiple of 8 (or the full batch when B < 8) within the budget.
    if B < _SUBLANE:
        tb_cap = B                              # block dim == full array dim (allowed)
    else:
        tb_cap = (B // _SUBLANE) * _SUBLANE     # last block overhangs; writes are masked
    tb_max = max(_SUBLANE, (_MAX_BLOCK_BYTES // (tn * itemsize)) // _SUBLANE * _SUBLANE)
    tb = min(tb_cap, tb_max)

    # v7x megacore: when the problem is big enough to split, give the parallel grid
    # at least ~4 steps so both TensorCores get work.
    if (B * D * itemsize > (1 << 20)
            and pl.cdiv(B, tb) * pl.cdiv(D, tn) < 4
            and B >= 4 * _SUBLANE):
        tb = max(_SUBLANE, _round_up(pl.cdiv(B, 4), _SUBLANE))
    return tb, tn


def _inversion_kernel(x_ref, s_ref, o_ref):
    # (tb, tn) * (1, tn) broadcast multiply on the VPU.
    o_ref[...] = x_ref[...] * s_ref[...]


def _apply_inversion(x, signs_row):
    """x: (B, D); signs_row: (1, D) of +/-1 in x.dtype. Returns x * signs_row."""
    B, D = x.shape
    itemsize = jnp.dtype(x.dtype).itemsize
    tb, tn = _choose_tiles(B, D, itemsize)
    grid = (pl.cdiv(B, tb), pl.cdiv(D, tn))
    cost = pl.CostEstimate(
        flops=B * D,
        transcendentals=0,
        bytes_accessed=(2 * B * D + D) * itemsize,    # un-padded traffic
    )
    return pl.pallas_call(
        _inversion_kernel,
        out_shape=jax.ShapeDtypeStruct((B, D), x.dtype),
        grid=grid,
        in_specs=[
            pl.BlockSpec((tb, tn), lambda i, j: (i, j)),
            pl.BlockSpec((1, tn), lambda i, j: (0, j)),   # sign row: resident along batch
        ],
        out_specs=pl.BlockSpec((tb, tn), lambda i, j: (i, j)),
        compiler_params=pltpu.CompilerParams(
            dimension_semantics=("parallel", "parallel"),
            vmem_limit_bytes=_VMEM_LIMIT_BYTES,
        ),
        cost_estimate=cost,
    )(x, signs_row)


class Inversion:
    """JAX/Pallas equivalent of cuequivariance_torch.Inversion for O3 irreps.

    irreps: tuple of (mul, l, parity) with parity in {+1, -1}.
    Input/output: (batch, dim) with dim = sum(mul * (2l+1)); segment-contiguous layout
    (mul_ir or ir_mul -- the op is layout-invariant, so layout transposes are identity).
    """

    # TODO(synk): math_dtype / the CUDA 'uniform_1d' SegmentedPolynomial dispatch of the
    #             torch module are not modeled; the sign multiply runs in the input dtype.

    def __init__(self, irreps):
        self.irreps = tuple((int(m), int(l), int(p)) for m, l, p in irreps)
        for _, l, p in self.irreps:
            if p not in (1, -1):
                raise ValueError("parity must be +1 or -1 (O3 irreps)")
            if l < 0:
                raise ValueError("l must be >= 0")
        self.dim = sum(m * (2 * l + 1) for m, l, _ in self.irreps)
        if self.dim:
            self._signs_np = np.concatenate(
                [np.full((m * (2 * l + 1),), float(p), np.float32)
                 for m, l, p in self.irreps]).reshape(1, -1)
        else:
            self._signs_np = np.zeros((1, 0), np.float32)
        self._sign_rows = {}                        # dtype -> (1, dim) device constant
        self._forward = jax.jit(_apply_inversion)

    def _sign_row(self, dtype):
        key = jnp.dtype(dtype)
        row = self._sign_rows.get(key)
        if row is None:
            row = jnp.asarray(self._signs_np, dtype=key)
            self._sign_rows[key] = row
        return row

    def __call__(self, x):
        if x.ndim != 2 or x.shape[1] != self.dim:
            raise ValueError(f"expected input of shape (batch, {self.dim})")
        if x.shape[0] == 0 or self.dim == 0:        # empty-batch / empty-irreps guard
            return x
        return self._forward(x, self._sign_row(x.dtype))


# ----------------------------------------------------------------------------------
if __name__ == "__main__":
    key = jax.random.PRNGKey(0)

    # O3 irreps (mul, l, parity): 16x0e + 8x1o + 4x2e  -> dim = 16 + 24 + 20 = 60
    irreps = ((16, 0, +1), (8, 1, -1), (4, 2, +1))
    inv = Inversion(irreps)
    signs = inv._signs_np                           # (1, 60) exact reference signs

    # Main case.
    B = 32
    x = jax.random.normal(key, (B, inv.dim), dtype=jnp.float32)
    out = jax.block_until_ready(inv(x))
    assert out.shape == x.shape and out.dtype == x.dtype
    np.testing.assert_allclose(np.asarray(out), np.asarray(x) * signs, rtol=0, atol=0)

    # Ragged batch < 8 rows: batch block equals the full batch dim.
    x2 = jax.random.normal(jax.random.PRNGKey(1), (7, inv.dim), dtype=jnp.float32)
    out2 = jax.block_until_ready(inv(x2))
    np.testing.assert_allclose(np.asarray(out2), np.asarray(x2) * signs, rtol=0, atol=0)

    # Ragged batch > 8 rows, not a multiple of the tile: overhanging last block (masked writes).
    x3 = jax.random.normal(jax.random.PRNGKey(2), (19, inv.dim), dtype=jnp.float32)
    out3 = jax.block_until_ready(inv(x3))
    np.testing.assert_allclose(np.asarray(out3), np.asarray(x3) * signs, rtol=0, atol=0)

    print("KERNEL_OK")
</pallas_src>

<mosaic_0001>
module attributes {stable_mosaic.version = 11 : i64} {
  func.func @_inversion_kernel(%arg0: i32, %arg1: i32, %arg2: memref<32x60xf32, #tpu.memory_space<vmem>>, %arg3: memref<1x60xf32, #tpu.memory_space<vmem>>, %arg4: memref<32x60xf32, #tpu.memory_space<vmem>>) attributes {dimension_semantics = [#tpu.dimension_semantics<parallel>, #tpu.dimension_semantics<parallel>], iteration_bounds = array<i64: 1, 1>, scalar_prefetch = 0 : i64, scratch_operands = 0 : i64, tpu.core_type = #tpu.core_type<tc>, window_params = [{transform_indices = @transform_0, window_bounds = array<i64: 32, 60>}, {transform_indices = @transform_1, window_bounds = array<i64: 1, 60>}, {transform_indices = @transform_2, window_bounds = array<i64: 32, 60>}]} {
    %c0 = arith.constant 0 : index
    %c0_0 = arith.constant 0 : index
    %0 = vector.load %arg2[%c0, %c0_0] : memref<32x60xf32, #tpu.memory_space<vmem>>, vector<32x60xf32>
    %c0_1 = arith.constant 0 : index
    %c0_2 = arith.constant 0 : index
    %1 = vector.load %arg3[%c0_1, %c0_2] : memref<1x60xf32, #tpu.memory_space<vmem>>, vector<1x60xf32>
    %2 = vector.broadcast %1 : vector<1x60xf32> to vector<32x60xf32>
    %3 = arith.mulf %0, %2 : vector<32x60xf32>
    %c0_3 = arith.constant 0 : index
    %c0_4 = arith.constant 0 : index
    %4 = vector.load %arg4[%c0_3, %c0_4] : memref<32x60xf32, #tpu.memory_space<vmem>>, vector<32x60xf32>
    tpu.vector_store %arg4[%c0_3, %c0_4], %3 {strides = array<i32>} : memref<32x60xf32, #tpu.memory_space<vmem>>, vector<32x60xf32>,
    return
  }
  func.func @transform_0(%arg0: i32, %arg1: i32) -> (i32, i32) {
    %c0_i32 = arith.constant 0 : i32
    return %arg0, %arg1 : i32, i32
  }
  func.func @transform_1(%arg0: i32, %arg1: i32) -> (i32, i32) {
    %c0_i32 = arith.constant 0 : i32
    %c0_i32_0 = arith.constant 0 : i32
    return %c0_i32, %arg1 : i32, i32
  }
  func.func @transform_2(%arg0: i32, %arg1: i32) -> (i32, i32) {
    %c0_i32 = arith.constant 0 : i32
    return %arg0, %arg1 : i32, i32
  }
}

</mosaic_0001>

<bundles_post_ra>
// kernel: _apply_inversion.1
= control target key start
LH: loop header
LB: loop body
LE: loop exit
PB: predicated region body
PF: predicated region fallthrough
CT: control target
= control target key end

     0   :  { %7 = vsyncpa [#allocation3], 0  ;;  %s202_s0 = inlined_call_operand.hbm [shape: f32[32,60], index: 0, kind: input, shape index: {}]   ;;  %s203_s1 = inlined_call_operand.hbm [shape: f32[1,60], index: 1, kind: input, shape index: {}]   ;;  %s204_s2 = inlined_call_operand.hbm [shape: f32[32,60], index: 2, kind: output, shape index: {}]  }
   0x1   :  { %8 = vsyncpa [#allocation6], 0 }
   0x2   :  { %9 = vsyncpa [#allocation4], 0  ;;  %s14_s11 = sshll.u32 %s202_s0, 4  ;;  %s163_s12 = smov [#allocation2]   ;;  %s15_s11 = int_to_ptr.hbm [resolvable:$true] %s14_s11 }
   0x3   :  { %s16_s13 = sshll.u32 %s163_s12, 4  ;;  %s28_s16 = sshll.u32 %s203_s1, 4  ;;  %s17_s13 = int_to_ptr.vmem [resolvable:$true] %s16_s13  ;;  %s29_s16 = int_to_ptr.hbm [resolvable:$true] %s28_s16 }
   0x4   :  { %s164_s17 = smov 128   ;;  %s165_s18 = smov 8  }
   0x5   :  { %22 = dma.hbm_to_vmem [thread:$0]  %s15_s11, 512, %s17_s13, [#allocation3], %s164_s17, %s164_s17, %s165_s18  }
   0x6   :  { %s166_s19 = smov [#allocation5]  }
   0x7   :  { %s30_s20 = sshll.u32 %s166_s19, 4  ;;  %s31_s20 = int_to_ptr.vmem [resolvable:$true] %s30_s20 }
   0x8   :  { %33 = dma.hbm_to_vmem [thread:$0]  %s29_s16, 16, %s31_s20, [#allocation6]  }
   0x9   :  { %157 = dma.done.wait [#allocation3], 512  }
   0xa   :  { %158 = vsyncadd [#allocation3], 4294966784 }
   0xb   :  { %159 = dma.done.wait [#allocation6], 16  }
   0xc   :  { %160 = vsyncadd [#allocation6], 4294967280  ;;  %v42_v0 = vld [vmem:[#allocation2] sm:$0xff]  ;;  %vm54_vm0 = vcmask 490496   ;;  %v43_v2 = vld [vmem:[#allocation2 + $0x8] sm:$0xff]  ;;  %s167_s0 = smov [#allocation7]  }
   0xd   :  { %v84_v1 = vld [vmem:[#allocation5] ss:$0 sm:$0xff]  ;;  %v44_v3 = vld [vmem:[#allocation2 + $0x10] sm:$0xff]  ;;  %v45_v4 = vld [vmem:[#allocation2 + $0x18] sm:$0xff]  ;;  %s63_s1 = sshll.u32 %s167_s0, 4  ;;  %s65_s23 = sshll.u32 %s204_s2, 4  ;;  %s64_s1 = int_to_ptr.vmem [resolvable:$true] %s63_s1  ;;  %s66_s23 = int_to_ptr.hbm [resolvable:$true] %s65_s23 }
   0xe   :  { %v50_v5 = vmul.f32 %v84_v1, %v42_v0  ;;  %v51_v6 = vmul.f32 %v84_v1, %v43_v2  ;;  %v52_v7 = vmul.f32 %v84_v1, %v44_v3  ;;  %v53_v8 = vmul.f32 %v84_v1, %v45_v4 }
  0x10   :  { %55 = vst.msk [vmem:[#allocation7] sm:$0xff] %vm54_vm0, %v50_v5 }
  0x11   :  { %56 = vst.msk [vmem:[#allocation7 + $0x8] sm:$0xff] %vm54_vm0, %v51_v6 }
  0x12   :  { %57 = vst.msk [vmem:[#allocation7 + $0x10] sm:$0xff] %vm54_vm0, %v52_v7 }
  0x13   :  { %58 = vst.msk [vmem:[#allocation7 + $0x18] sm:$0xff] %vm54_vm0, %v53_v8 }
  0x14   :  { %71 = dma.vmem_to_hbm [thread:$0]  %s64_s1, 512, %s66_s23, [#allocation4], %s164_s17, %s164_s17, %s165_s18  }
  0x15   :  { %161 = dma.done.wait [#allocation4], 512  }
  0x16   :  { %162 = vsyncadd [#allocation4], 4294966784 }
  0x17   :  { %76 = vsyncpa [#allocation3], 1 }
  0x18   :  { %77 = vsyncpa [#allocation6], 1 }
  0x19   :  { %78 = vsyncpa [#allocation4], 1 }

</bundles_post_ra>
